<compile_context>
chip_gen: v7x
topology: tpu7x:2x2x1
jax: 0.10.0
libtpu: 0.0.40
codegen_flags: <defaults>
</compile_context>

<pallas_src>
import functools

import jax
import jax.numpy as jnp
from jax.experimental import pallas as pl
from jax.experimental.pallas import tpu as pltpu


def _round_up(n, m):
    return ((n + m - 1) // m) * m


def _temporal_block_kernel(xi_ref, w1_ref, b1_ref, w2_ref, b2_ref, out_ref, h1p_ref,
                           *, L, K, dilation, padding, pad8, TB):
    """Fused conv1 (+ fused 1x1 residual) -> relu -> conv2 -> relu -> add -> relu.

    xi_ref : (TB, L, Cfold_p)        bf16  host-folded conv1 input (K taps in lanes)
    w1_ref : (Cfold_p, 2*Cout_p)     bf16  [conv1 | 1x1-residual] fused weight
    b1_ref : (1, 2*Cout_p)           f32   [b1 | bd]
    w2_ref : (K, Cout_p, Cout_p)     bf16  conv2 weight, one matrix per tap
    b2_ref : (1, Cout_p)             f32
    out_ref: (TB, L, Cout_p)         bf16  output block
    h1p_ref: (TB, pad8 + L, Cout_p)  bf16  scratch: replicate-padded relu(conv1)
    """
    Cfold_p = xi_ref.shape[-1]
    Cout_p = out_ref.shape[-1]

    # ---- conv1 + fused 1x1 residual: ONE MXU pass, N = 2*Cout_p ----
    xi = xi_ref[...].reshape(TB * L, Cfold_p)                       # free reshape
    big = jnp.dot(xi, w1_ref[...], preferred_element_type=jnp.float32) + b1_ref[...]
    h1 = jnp.maximum(big[:, :Cout_p], 0.0).astype(jnp.bfloat16)     # relu1 -> bf16
    res = big[:, Cout_p:]                                           # 1x1 residual, f32
    # TODO(synk): dropout1/dropout2 are identity (inference mode); weight_norm
    #             is assumed pre-applied to the effective weights.

    # ---- replicate-left-pad relu(conv1) via a small VMEM scratch (aligned store) ----
    h1_3d = h1.reshape(TB, L, Cout_p)
    h1p_ref[:, pad8:pad8 + L, :] = h1_3d
    if pad8 > 0:
        h1p_ref[:, 0:pad8, :] = jnp.broadcast_to(h1_3d[:, 0:1, :], (TB, pad8, Cout_p))

    # ---- conv2: K accumulating matmuls of depth Cout_p (no im2col slab) ----
    start0 = pad8 - padding
    acc2 = None
    for t in range(K):                                              # K static & small
        s = start0 + t * dilation
        tap = h1p_ref[:, s:s + L, :].reshape(TB * L, Cout_p)
        d = jnp.dot(tap, w2_ref[t], preferred_element_type=jnp.float32)
        acc2 = d if acc2 is None else acc2 + d
    h2 = jnp.maximum(acc2 + b2_ref[...], 0.0)                       # relu2, f32

    # ---- residual add + final relu, single lane-dense bf16 store ----
    out = jnp.maximum(h2 + res, 0.0)
    out_ref[...] = out.reshape(TB, L, Cout_p).astype(out_ref.dtype)


def temporal_block(x, params, *, kernel_size, dilation, padding, tb=None):
    """x: (B, C_in, L) float32 (PyTorch NCL). Returns (B, C_out, L) float32."""
    B, Cin, L = x.shape
    K = kernel_size
    # Standard TCN setting; guarantees out length == L so the residual add is valid.
    assert padding == dilation * (K - 1), "TemporalBlock expects padding = dilation*(k-1)"
    Cout = params["w1"].shape[-1]

    Cout_p = _round_up(Cout, 128)
    Cfold_p = _round_up(K * Cin, 128)        # folded conv1 contraction depth
    pad8 = _round_up(padding, 8)             # sublane-aligned scratch prefix

    # ---- explicit per-step VMEM accounting (blocks + scratch + weights + live) ----
    w_bytes = 2 * (Cfold_p * 2 * Cout_p * 2          # w1_big (double-buffered)
                   + K * Cout_p * Cout_p * 2         # w2
                   + 2 * Cout_p * 4 + Cout_p * 4)    # biases

    def _step_vmem_bytes(tb_):
        in_blk = 2 * tb_ * L * Cfold_p * 2                       # bf16 input block x2
        out_blk = 2 * tb_ * L * Cout_p * 2                       # bf16 output block x2
        scratch = tb_ * (pad8 + L) * Cout_p * 2                  # conv2 pad scratch
        live = tb_ * L * Cout_p * (2 * 4 + 4 + 4 + 2 + 2 + 2)    # big/res/acc2/h1/tap/out
        return in_blk + out_blk + scratch + w_bytes + live

    try:
        info = pltpu.get_tpu_info()
        phys_vmem = int(getattr(info, "vmem_capacity_bytes", 64 * 1024 * 1024))
    except Exception:  # interpret mode / unknown part
        phys_vmem = 64 * 1024 * 1024
    budget = (phys_vmem * 3) // 4                                 # leave compiler headroom

    if tb is None:
        max_tb = max(1, B // 2)       # keep >= 2 grid steps (v7x megacore + pipelining)
        cands = [c for c in (8, 4, 2, 1) if B % c == 0 and c <= max_tb] or [1]
        tb = next((c for c in cands if _step_vmem_bytes(c) <= budget), cands[-1])
    assert B % tb == 0

    vmem_limit = int(min(max(2 * _step_vmem_bytes(tb), 32 * 1024 * 1024), budget))

    # ---- host-side layout prep: channels-last, causal replicate pad, host im2col ----
    x_lc = jnp.transpose(x, (0, 2, 1))                                   # (B, L, Cin)
    xp = jnp.pad(x_lc, ((0, 0), (padding, 0), (0, 0)), mode="edge")      # causal pad
    xi = jnp.concatenate(
        [xp[:, t * dilation:t * dilation + L, :] for t in range(K)], axis=-1)  # (B, L, K*Cin)
    xi = jnp.pad(xi, ((0, 0), (0, 0), (0, Cfold_p - K * Cin))).astype(jnp.bfloat16)

    # fused [conv1 | 1x1 residual] weight; residual lives only in the last-tap rows
    # (the last tap of the host im2col is the un-shifted input x).
    w1_big = jnp.zeros((Cfold_p, 2 * Cout_p), jnp.float32)
    w1_big = w1_big.at[:K * Cin, :Cout].set(params["w1"].reshape(K * Cin, Cout))
    w1_big = w1_big.at[(K - 1) * Cin:K * Cin, Cout_p:Cout_p + Cout].set(params["wd"])
    w1_big = w1_big.astype(jnp.bfloat16)
    b1_big = jnp.zeros((1, 2 * Cout_p), jnp.float32)
    b1_big = b1_big.at[:, :Cout].set(params["b1"])
    b1_big = b1_big.at[:, Cout_p:Cout_p + Cout].set(params["bd"])

    w2 = jnp.pad(params["w2"],
                 ((0, 0), (0, Cout_p - Cout), (0, Cout_p - Cout))).astype(jnp.bfloat16)
    b2 = jnp.pad(params["b2"], ((0, 0), (0, Cout_p - Cout))).astype(jnp.float32)

    kern = functools.partial(_temporal_block_kernel, L=L, K=K, dilation=dilation,
                             padding=padding, pad8=pad8, TB=tb)

    out_nlc = pl.pallas_call(
        kern,
        out_shape=jax.ShapeDtypeStruct((B, L, Cout_p), jnp.bfloat16),
        grid_spec=pltpu.PrefetchScalarGridSpec(
            num_scalar_prefetch=0,
            grid=(B // tb,),
            in_specs=[
                pl.BlockSpec((tb, L, Cfold_p), lambda g: (g, 0, 0)),        # folded input
                pl.BlockSpec((Cfold_p, 2 * Cout_p), lambda g: (0, 0)),      # [w1 | wd]
                pl.BlockSpec((1, 2 * Cout_p), lambda g: (0, 0)),            # [b1 | bd]
                pl.BlockSpec((K, Cout_p, Cout_p), lambda g: (0, 0, 0)),     # w2
                pl.BlockSpec((1, Cout_p), lambda g: (0, 0)),                # b2
            ],
            out_specs=pl.BlockSpec((tb, L, Cout_p), lambda g: (g, 0, 0)),
            scratch_shapes=[pltpu.VMEM((tb, pad8 + L, Cout_p), jnp.bfloat16)],
        ),
        compiler_params=pltpu.CompilerParams(
            dimension_semantics=("parallel",),
            vmem_limit_bytes=vmem_limit),
    )(xi, w1_big, b1_big, w2, b2)

    out = out_nlc[:, :, :Cout].astype(jnp.float32)        # drop lane pad
    return jnp.transpose(out, (0, 2, 1))                  # back to NCL


def init_params(key, Cin, Cout, K):
    """Deterministic synthetic init mirroring the module's parameter shapes.

    conv1/conv2 are weight_norm'd: w = g * v / ||v|| (norm per out channel).
    At init PyTorch sets g = ||v||, so the effective weight equals v.  For
    trained checkpoints pass the pre-normalized effective weight g*v/||v||.
    """
    ks = jax.random.split(key, 6)
    v1 = 0.01 * jax.random.normal(ks[0], (Cout, Cin, K), jnp.float32)
    v2 = 0.01 * jax.random.normal(ks[1], (Cout, Cout, K), jnp.float32)

    def weight_norm(v):
        n = jnp.sqrt(jnp.sum(v * v, axis=(1, 2), keepdims=True))
        g = n                       # PyTorch weight_norm initializes g to per-channel norm
        return g * v / n            # == v at init

    # reshape PyTorch (C_out, C_in, K) -> kernel layout (K, C_in, C_out)
    w1 = jnp.transpose(weight_norm(v1), (2, 1, 0))
    w2 = jnp.transpose(weight_norm(v2), (2, 1, 0))

    wd_t = 0.01 * jax.random.normal(ks[2], (Cout, Cin, 1), jnp.float32)   # 1x1 conv
    wd = jnp.transpose(wd_t[:, :, 0], (1, 0))                             # (C_in, C_out)

    b1 = 0.05 * jax.random.normal(ks[3], (1, Cout), jnp.float32)
    b2 = 0.05 * jax.random.normal(ks[4], (1, Cout), jnp.float32)
    bd = 0.05 * jax.random.normal(ks[5], (1, Cout), jnp.float32)
    return dict(w1=w1, b1=b1, w2=w2, b2=b2, wd=wd, bd=bd)


def _reference(x, p, K, dilation, padding):
    """Pure-JAX reference (NCL in, NCL out) with the SAME bf16 quantization of
    activations/weights/output and f32 accumulation as the kernel."""
    B, Cin, L = x.shape
    xb = jnp.transpose(x, (0, 2, 1)).astype(jnp.bfloat16)            # (B, L, Cin)
    xpad = jnp.pad(xb, ((0, 0), (padding, 0), (0, 0)), mode="edge")  # causal pad

    def conv(xp_blc, w_kco, b):
        Cout = w_kco.shape[-1]
        wb = w_kco.astype(jnp.bfloat16)
        acc = jnp.zeros((B, L, Cout), jnp.float32)
        for t in range(K):
            acc += jnp.einsum("blc,cd->bld",
                              xp_blc[:, t * dilation:t * dilation + L, :], wb[t],
                              preferred_element_type=jnp.float32)
        return acc + b

    h1 = jax.nn.relu(conv(xpad, p["w1"], p["b1"]))
    h1b = h1.astype(jnp.bfloat16)
    h1p = jnp.pad(h1b, ((0, 0), (padding, 0), (0, 0)), mode="edge")
    h2 = jax.nn.relu(conv(h1p, p["w2"], p["b2"]))
    res = jnp.einsum("blc,cd->bld", xb, p["wd"].astype(jnp.bfloat16),
                     preferred_element_type=jnp.float32) + p["bd"]
    out = jax.nn.relu(h2 + res).astype(jnp.bfloat16).astype(jnp.float32)
    return jnp.transpose(out, (0, 2, 1))


if __name__ == "__main__":
    key = jax.random.PRNGKey(0)
    kx, kp = jax.random.split(key)

    B, Cin, Cout, L = 2, 4, 8, 16
    K, dilation = 3, 2
    padding = dilation * (K - 1)            # = 4, standard causal TCN padding

    x = jax.random.normal(kx, (B, Cin, L), jnp.float32)
    params = init_params(kp, Cin, Cout, K)

    out = temporal_block(x, params, kernel_size=K, dilation=dilation, padding=padding)
    out = jax.block_until_ready(out)

    ref = _reference(x, params, K, dilation, padding)
    assert out.shape == (B, Cout, L)
    err = float(jnp.max(jnp.abs(out - ref)))
    assert err < 2e-3, f"mismatch vs JAX reference (max abs err {err})"

    print("KERNEL_OK")
</pallas_src>

<mosaic_0001>
module attributes {stable_mosaic.version = 11 : i64} {
  func.func @_temporal_block_kernel(%arg0: i32, %arg1: memref<1x16x128xbf16, #tpu.memory_space<vmem>>, %arg2: memref<128x256xbf16, #tpu.memory_space<vmem>>, %arg3: memref<1x256xf32, #tpu.memory_space<vmem>>, %arg4: memref<3x128x128xbf16, #tpu.memory_space<vmem>>, %arg5: memref<1x128xf32, #tpu.memory_space<vmem>>, %arg6: memref<1x16x128xbf16, #tpu.memory_space<vmem>>, %arg7: memref<1x24x128xbf16, #tpu.memory_space<vmem>>) attributes {dimension_semantics = [#tpu.dimension_semantics<parallel>], iteration_bounds = array<i64: 2>, scalar_prefetch = 0 : i64, scratch_operands = 1 : i64, tpu.core_type = #tpu.core_type<tc>, window_params = [{transform_indices = @transform_0, window_bounds = array<i64: 1, 16, 128>}, {pipeline_mode = #tpu.pipeline_mode<synchronous>, transform_indices = @transform_1, window_bounds = array<i64: 128, 256>}, {pipeline_mode = #tpu.pipeline_mode<synchronous>, transform_indices = @transform_2, window_bounds = array<i64: 1, 256>}, {pipeline_mode = #tpu.pipeline_mode<synchronous>, transform_indices = @transform_3, window_bounds = array<i64: 3, 128, 128>}, {pipeline_mode = #tpu.pipeline_mode<synchronous>, transform_indices = @transform_4, window_bounds = array<i64: 1, 128>}, {transform_indices = @transform_5, window_bounds = array<i64: 1, 16, 128>}]} {
    %c0 = arith.constant 0 : index
    %c0_0 = arith.constant 0 : index
    %c0_1 = arith.constant 0 : index
    %0 = vector.load %arg1[%c0, %c0_0, %c0_1] : memref<1x16x128xbf16, #tpu.memory_space<vmem>>, vector<1x16x128xbf16>
    %1 = vector.shape_cast %0 : vector<1x16x128xbf16> to vector<16x128xbf16>
    %c0_2 = arith.constant 0 : index
    %c0_3 = arith.constant 0 : index
    %2 = vector.load %arg2[%c0_2, %c0_3] : memref<128x256xbf16, #tpu.memory_space<vmem>>, vector<128x256xbf16>
    %cst = arith.constant dense<0.000000e+00> : vector<16x256xf32>
    %3 = tpu.matmul %1, %2, %cst {dimension_numbers = #tpu.dot_dimension_numbers<[1], [0], [0], [1], [0, 0, 1, 1], [], []>} : vector<16x128xbf16>, vector<128x256xbf16>, vector<16x256xf32> -> vector<16x256xf32>
    %c0_4 = arith.constant 0 : index
    %c0_5 = arith.constant 0 : index
    %4 = vector.load %arg3[%c0_4, %c0_5] : memref<1x256xf32, #tpu.memory_space<vmem>>, vector<1x256xf32>
    %5 = vector.broadcast %4 : vector<1x256xf32> to vector<16x256xf32>
    %6 = arith.addf %3, %5 : vector<16x256xf32>
    %7 = vector.extract_strided_slice %6 {offsets = [0, 0], sizes = [16, 128], strides = [1, 1]} : vector<16x256xf32> to vector<16x128xf32>
    %cst_6 = arith.constant 0.000000e+00 : f32
    %8 = vector.broadcast %cst_6 : f32 to vector<16x128xf32>
    %9 = arith.maximumf %7, %8 : vector<16x128xf32>
    %10 = arith.truncf %9 : vector<16x128xf32> to vector<16x128xbf16>
    %11 = vector.extract_strided_slice %6 {offsets = [0, 128], sizes = [16, 128], strides = [1, 1]} : vector<16x256xf32> to vector<16x128xf32>
    %12 = vector.shape_cast %10 : vector<16x128xbf16> to vector<1x16x128xbf16>
    %c0_7 = arith.constant 0 : index
    %c8 = arith.constant 8 : index
    %c0_8 = arith.constant 0 : index
    %13 = vector.load %arg7[%c0_7, %c8, %c0_8] : memref<1x24x128xbf16, #tpu.memory_space<vmem>>, vector<1x16x128xbf16>
    tpu.vector_store %arg7[%c0_7, %c8, %c0_8], %12 {strides = array<i32>} : memref<1x24x128xbf16, #tpu.memory_space<vmem>>, vector<1x16x128xbf16>,
    %14 = vector.extract_strided_slice %12 {offsets = [0, 0, 0], sizes = [1, 1, 128], strides = [1, 1, 1]} : vector<1x16x128xbf16> to vector<1x1x128xbf16>
    %15 = vector.shape_cast %14 : vector<1x1x128xbf16> to vector<1x1x128xbf16>
    %16 = vector.broadcast %15 : vector<1x1x128xbf16> to vector<1x8x128xbf16>
    %c0_9 = arith.constant 0 : index
    %c0_10 = arith.constant 0 : index
    %c0_11 = arith.constant 0 : index
    %17 = vector.load %arg7[%c0_9, %c0_10, %c0_11] : memref<1x24x128xbf16, #tpu.memory_space<vmem>>, vector<1x8x128xbf16>
    tpu.vector_store %arg7[%c0_9, %c0_10, %c0_11], %16 {strides = array<i32>} : memref<1x24x128xbf16, #tpu.memory_space<vmem>>, vector<1x8x128xbf16>,
    %c0_12 = arith.constant 0 : index
    %c4 = arith.constant 4 : index
    %c0_13 = arith.constant 0 : index
    %18 = vector.load %arg7[%c0_12, %c4, %c0_13] : memref<1x24x128xbf16, #tpu.memory_space<vmem>>, vector<1x16x128xbf16>
    %19 = vector.shape_cast %18 : vector<1x16x128xbf16> to vector<16x128xbf16>
    %c0_14 = arith.constant 0 : index
    %c0_15 = arith.constant 0 : index
    %c0_16 = arith.constant 0 : index
    %20 = vector.load %arg4[%c0_14, %c0_15, %c0_16] : memref<3x128x128xbf16, #tpu.memory_space<vmem>>, vector<1x128x128xbf16>
    %21 = vector.shape_cast %20 : vector<1x128x128xbf16> to vector<128x128xbf16>
    %cst_17 = arith.constant dense<0.000000e+00> : vector<16x128xf32>
    %22 = tpu.matmul %19, %21, %cst_17 {dimension_numbers = #tpu.dot_dimension_numbers<[1], [0], [0], [1], [0, 0, 1, 1], [], []>} : vector<16x128xbf16>, vector<128x128xbf16>, vector<16x128xf32> -> vector<16x128xf32>
    %c0_18 = arith.constant 0 : index
    %c6 = arith.constant 6 : index
    %c0_19 = arith.constant 0 : index
    %23 = vector.load %arg7[%c0_18, %c6, %c0_19] : memref<1x24x128xbf16, #tpu.memory_space<vmem>>, vector<1x16x128xbf16>
    %24 = vector.shape_cast %23 : vector<1x16x128xbf16> to vector<16x128xbf16>
    %c1 = arith.constant 1 : index
    %c0_20 = arith.constant 0 : index
    %c0_21 = arith.constant 0 : index
    %25 = vector.load %arg4[%c1, %c0_20, %c0_21] : memref<3x128x128xbf16, #tpu.memory_space<vmem>>, vector<1x128x128xbf16>
    %26 = vector.shape_cast %25 : vector<1x128x128xbf16> to vector<128x128xbf16>
    %cst_22 = arith.constant dense<0.000000e+00> : vector<16x128xf32>
    %27 = tpu.matmul %24, %26, %cst_22 {dimension_numbers = #tpu.dot_dimension_numbers<[1], [0], [0], [1], [0, 0, 1, 1], [], []>} : vector<16x128xbf16>, vector<128x128xbf16>, vector<16x128xf32> -> vector<16x128xf32>
    %28 = arith.addf %22, %27 : vector<16x128xf32>
    %c0_23 = arith.constant 0 : index
    %c8_24 = arith.constant 8 : index
    %c0_25 = arith.constant 0 : index
    %29 = vector.load %arg7[%c0_23, %c8_24, %c0_25] : memref<1x24x128xbf16, #tpu.memory_space<vmem>>, vector<1x16x128xbf16>
    %30 = vector.shape_cast %29 : vector<1x16x128xbf16> to vector<16x128xbf16>
    %c2 = arith.constant 2 : index
    %c0_26 = arith.constant 0 : index
    %c0_27 = arith.constant 0 : index
    %31 = vector.load %arg4[%c2, %c0_26, %c0_27] : memref<3x128x128xbf16, #tpu.memory_space<vmem>>, vector<1x128x128xbf16>
    %32 = vector.shape_cast %31 : vector<1x128x128xbf16> to vector<128x128xbf16>
    %cst_28 = arith.constant dense<0.000000e+00> : vector<16x128xf32>
    %33 = tpu.matmul %30, %32, %cst_28 {dimension_numbers = #tpu.dot_dimension_numbers<[1], [0], [0], [1], [0, 0, 1, 1], [], []>} : vector<16x128xbf16>, vector<128x128xbf16>, vector<16x128xf32> -> vector<16x128xf32>
    %34 = arith.addf %28, %33 : vector<16x128xf32>
    %c0_29 = arith.constant 0 : index
    %c0_30 = arith.constant 0 : index
    %35 = vector.load %arg5[%c0_29, %c0_30] : memref<1x128xf32, #tpu.memory_space<vmem>>, vector<1x128xf32>
    %36 = vector.broadcast %35 : vector<1x128xf32> to vector<16x128xf32>
    %37 = arith.addf %34, %36 : vector<16x128xf32>
    %cst_31 = arith.constant 0.000000e+00 : f32
    %38 = vector.broadcast %cst_31 : f32 to vector<16x128xf32>
    %39 = arith.maximumf %37, %38 : vector<16x128xf32>
    %40 = arith.addf %39, %11 : vector<16x128xf32>
    %cst_32 = arith.constant 0.000000e+00 : f32
    %41 = vector.broadcast %cst_32 : f32 to vector<16x128xf32>
    %42 = arith.maximumf %40, %41 : vector<16x128xf32>
    %43 = vector.shape_cast %42 : vector<16x128xf32> to vector<1x16x128xf32>
    %44 = arith.truncf %43 : vector<1x16x128xf32> to vector<1x16x128xbf16>
    %c0_33 = arith.constant 0 : index
    %c0_34 = arith.constant 0 : index
    %c0_35 = arith.constant 0 : index
    %45 = vector.load %arg6[%c0_33, %c0_34, %c0_35] : memref<1x16x128xbf16, #tpu.memory_space<vmem>>, vector<1x16x128xbf16>
    tpu.vector_store %arg6[%c0_33, %c0_34, %c0_35], %44 {strides = array<i32>} : memref<1x16x128xbf16, #tpu.memory_space<vmem>>, vector<1x16x128xbf16>,
    return
  }
  func.func @transform_0(%arg0: i32) -> (i32, i32, i32) {
    %c0_i32 = arith.constant 0 : i32
    %c0_i32_0 = arith.constant 0 : i32
    %c0_i32_1 = arith.constant 0 : i32
    return %arg0, %c0_i32, %c0_i32_0 : i32, i32, i32
  }
  func.func @transform_1(%arg0: i32) -> (i32, i32) {
    %c0_i32 = arith.constant 0 : i32
    %c0_i32_0 = arith.constant 0 : i32
    %c0_i32_1 = arith.constant 0 : i32
    return %c0_i32, %c0_i32_0 : i32, i32
  }
  func.func @transform_2(%arg0: i32) -> (i32, i32) {
    %c0_i32 = arith.constant 0 : i32
    %c0_i32_0 = arith.constant 0 : i32
    %c0_i32_1 = arith.constant 0 : i32
    return %c0_i32, %c0_i32_0 : i32, i32
  }
  func.func @transform_3(%arg0: i32) -> (i32, i32, i32) {
    %c0_i32 = arith.constant 0 : i32
    %c0_i32_0 = arith.constant 0 : i32
    %c0_i32_1 = arith.constant 0 : i32
    %c0_i32_2 = arith.constant 0 : i32
    return %c0_i32, %c0_i32_0, %c0_i32_1 : i32, i32, i32
  }
  func.func @transform_4(%arg0: i32) -> (i32, i32) {
    %c0_i32 = arith.constant 0 : i32
    %c0_i32_0 = arith.constant 0 : i32
    %c0_i32_1 = arith.constant 0 : i32
    return %c0_i32, %c0_i32_0 : i32, i32
  }
  func.func @transform_5(%arg0: i32) -> (i32, i32, i32) {
    %c0_i32 = arith.constant 0 : i32
    %c0_i32_0 = arith.constant 0 : i32
    %c0_i32_1 = arith.constant 0 : i32
    return %arg0, %c0_i32, %c0_i32_0 : i32, i32, i32
  }
}

</mosaic_0001>

<bundles_post_ra>
// kernel: tpu_custom_call.1
= control target key start
LH: loop header
LB: loop body
LE: loop exit
PB: predicated region body
PF: predicated region fallthrough
CT: control target
= control target key end

     0   :  { %10 = vsyncpa [#allocation4], 0  ;;  %s1731_s0 = inlined_call_operand.hbm [shape: bf16[2,16,128], index: 0, kind: input, shape index: {}]   ;;  %s1732_s1 = inlined_call_operand.hbm [shape: bf16[128,256], index: 1, kind: input, shape index: {}]   ;;  %s1733_s2 = inlined_call_operand.vmem [shape: f32[1,256], index: 2, kind: input, shape index: {}]   ;;  %s1734_s3 = inlined_call_operand.hbm [shape: bf16[3,128,128], index: 3, kind: input, shape index: {}]   ;;  %s1735_s4 = inlined_call_operand.vmem [shape: f32[1,128], index: 4, kind: input, shape index: {}]   ;;  %s1736_s5 = inlined_call_operand.hbm [shape: bf16[2,16,128], index: 5, kind: output, shape index: {}]  }
   0x1   :  { %12 = vsyncpa [#allocation4 + $0x1], 0 }
   0x2   :  { %13 = vsyncpa [#allocation7], 0 }
   0x3   :  { %14 = vsyncpa [#allocation5], 0 }
   0x4   :  { %16 = vsyncpa [#allocation5 + $0x1], 0  ;;  %s1434_s18 = smov 0   ;;  %s1436_s19 = smov 0  }
   0x5   :  { %s1438_s20 = smov 0   ;;  %s1440_s21 = smov 0  }
   0x6 LB: > { %s1455_s22 = sadd.s32 4294967295, %s1389_s21   ;;  %s936_s23 = sadd.s32 4294967294, %s1389_s21   ;;  %s1389_s21 = sphi %s1440_s21, %s1756_s21   ;;  %s1385_s20 = sphi %s1438_s20, %s1755_s20   ;;  %s1381_s19 = sphi %s1436_s19, %s1754_s19   ;;  %s1377_s18 = sphi %s1434_s18, %s1753_s18  }
   0x7   : > { %p42_p0 = scmp.ne.s32.totalorder %s1381_s19, %s1377_s18  ;;  %p1737_p1 = scmp.eq.s32.totalorder %s1455_s22, 0 }
   0x8   : > { %p156_p3 = scmp.eq.s32.totalorder %s936_s23, 1  ;;  %p937_p5 = scmp.ge.s32.totalorder %s1389_s21, 1 }
   0x9   : > { %p1464_p4 = por %p1737_p1, %p42_p0  ;;  %p163_p7 = scmp.lt.s32.totalorder %s1389_s21, 3 }
   0xa   : > { %p1469_p6 = por %p156_p3, %p42_p0  ;;  %s1391_s27 = smov [#allocation6]  }
   0xb   : > { %s1740_s24 = scalar_select %p1464_p4, 1, 0 }
   0xc   : > { %s1741_s25 = scalar_select %p1469_p6, 1, 0 }
   0xd   : > { %p1474_p8 = pnand %p937_p5, %p163_p7  ;;  %s175_s28 = sshll.u32 %s1391_s27, 4  ;;  %s1478_s28 = int_to_ptr.vmem [resolvable:$true] %s175_s28 }
   0xe   : > { %s1392_s30 = smov [#allocation8]   ;;  %s1233_s9 = scalar_lea.hbm %s1732_s1, 2048 }
   0xf   : > { %p1115_p9 = pneg %p1474_p8  ;;  %s191_s6 = sshll.u32 %s1392_s30, 4  ;;  %s1489_s6 = int_to_ptr.vmem [resolvable:$true] %s191_s6 }
  0x10   : > { %p1234_p12 = scmp.ne.s32.totalorder %s1732_s1, %s1233_s9  ;;  %p1240_p5 = scmp.lt.u32.totalorder %s1233_s9, %s1732_s1 }
  0x11   : > { %p1485_p11 = pnand %p1115_p9, %p1737_p1 }
  0x13   : > { %p1235_p13 = pneg %p1485_p11 }
  0x15   : > { %p1236_p0 = pnand %p1235_p13, %p1234_p12 }
  0x17   : > { %p1237_p3 = pneg %p1236_p0 }
  0x19   : > { %p1242_p7 = pnand %p1240_p5, %p1237_p3 }
  0x1b   : > { %1245 = shalt.err (!%p1242_p7)
}
  0x1c   : > { %s1246_s14 = scalar_lea.vmem %s1478_s28, 2048  ;;  %p1254_p2 = scmp.lt.s32.totalorder %s1478_s28, %s1478_s28 }
  0x1d   : > { %p1247_p9 = scmp.ne.s32.totalorder %s1478_s28, %s1246_s14  ;;  %p1255_p12 = scmp.lt.s32.totalorder %s1246_s14, %s1246_s14 }
  0x1f   : > { %p1249_p10 = pnand %p1247_p9, %p1235_p13  ;;  %p1256_p0 = por %p1255_p12, %p1254_p2 }
  0x21   : > { %p1250_p1 = pneg %p1249_p10 }
  0x23   : > { %p1257_p6 = pnand %p1256_p0, %p1250_p1 }
  0x25   : > { %1260 = shalt.err (!%p1257_p6)
}
  0x26   : > { %s1393_s15 = smov 128   ;;  %s1394_s16 = smov 8  }
  0x27   : > { %1118 = dma.hbm_to_vmem [thread:$0]  (!%p1485_p11), %s1732_s1, 2048, %s1478_s28, [#allocation7], %s1393_s15, %s1393_s15, %s1394_s16  }
  0x28   : > { %s1261_s7 = scalar_lea.hbm %s1734_s3, 3072 }
  0x29   : > { %p1262_p2 = scmp.ne.s32.totalorder %s1734_s3, %s1261_s7  ;;  %p1268_p10 = scmp.lt.u32.totalorder %s1261_s7, %s1734_s3 }
  0x2b   : > { %p1264_p1 = pnand %p1262_p2, %p1235_p13 }
  0x2d   : > { %p1265_p6 = pneg %p1264_p1 }
  0x2f   : > { %p1270_p3 = pnand %p1268_p10, %p1265_p6 }
  0x31   : > { %1273 = shalt.err (!%p1270_p3)
}
  0x32   : > { %s1274_s28 = scalar_lea.vmem %s1489_s6, 3072  ;;  %p1282_p12 = scmp.lt.s32.totalorder %s1489_s6, %s1489_s6 }
  0x33   : > { %p1275_p5 = scmp.ne.s32.totalorder %s1489_s6, %s1274_s28  ;;  %p1283_p0 = scmp.lt.s32.totalorder %s1274_s28, %s1274_s28 }
  0x35   : > { %p1277_p7 = pnand %p1275_p5, %p1235_p13  ;;  %p1284_p2 = por %p1283_p0, %p1282_p12 }
  0x37   : > { %p1278_p9 = pneg %p1277_p7 }
  0x39   : > { %p1285_p1 = pnand %p1284_p2, %p1278_p9 }
  0x3b   : > { %1288 = shalt.err (!%p1285_p1)
}
  0x3c   : > { %s1395_s12 = smov 64   ;;  %s1396_s13 = smov 4  }
  0x3d   : > { %1121 = dma.hbm_to_vmem [thread:$0]  (!%p1485_p11), %s1734_s3, 3072, %s1489_s6, [#allocation7], %s1395_s12, %s1395_s12, %s1396_s13  }
  0x3e   : > { %s1547_s16 = sadd.s32 1, %s1389_s21   ;;  %s29_s23 = sadd.s32 1, %s1385_s20 }
  0x3f   : > { %s26_s17 = ssub.s32 %s1389_s21, %s1547_s16  ;;  %p36_p6 = scmp.ne.s32.totalorder %s1385_s20, %s1381_s19 }
  0x40   : > { %p27_p13 = scmp.eq.s32.totalorder %s26_s17, 0  ;;  %p37_p10 = scmp.eq.s32.totalorder %s1389_s21, 0 }
  0x41   : > { %p1744_p5 = scmp.eq.s32.totalorder %s1455_s22, 1  ;;  %p1132_p9 = scmp.lt.s32.totalorder %s1389_s21, 2 }
  0x42   : > { %s1556_s27 = scalar_select %p27_p13, %s1385_s20, %s29_s23  }
  0x43   : > { %p38_p3 = por %p37_p10, %p36_p6  ;;  %p1560_p7 = por %p1744_p5, %p36_p6 }
  0x44   : > { %s208_s30 = sand.u32 1, %s1385_s20   ;;  %s1005_s6 = sshll.u32 %s1389_s21, 7 }
  0x45   : > { %s1745_s29 = scalar_select %p1560_p7, 1, 0 }
  0x46   : > { %s941_s7 = sshll.u32 %s208_s30, 3  ;;  %s1570_s10 = scalar_lea.hbm %s1731_s0, %s1005_s6 }
  0x47   : > { %s212_s11 = scalar_lea.vmem [#allocation3], %s941_s7  ;;  %p1574_p11 = pnand %p1132_p9, %p38_p3 }
  0x48   : > { %s219_s28 = sshll.u32 %s212_s11, 4  ;;  %s1578_s15 = scalar_lea.sflag [#allocation4], %s208_s30  ;;  %s1572_s28 = int_to_ptr.vmem [resolvable:$true] %s219_s28 }
  0x49   : > { %s1289_s17 = scalar_lea.hbm %s1570_s10, 128  ;;  %p1291_p0 = pneg %p1574_p11 }
  0x4a   : > { %p1290_p12 = scmp.ne.s32.totalorder %s1570_s10, %s1289_s17  ;;  %s1294_s6 = scalar_lea.hbm %s1731_s0, 256 }
  0x4b   : > { %p1295_p13 = scmp.lt.u32.totalorder %s1570_s10, %s1731_s0  ;;  %p1296_p6 = scmp.lt.u32.totalorder %s1294_s6, %s1289_s17 }
  0x4c   : > { %p1292_p2 = pnand %p1291_p0, %p1290_p12  ;;  %p1298_p3 = scmp.lt.u32.totalorder %s1289_s17, %s1570_s10 }
  0x4d   : > { %p1297_p10 = por %p1296_p6, %p1295_p13 }
  0x4e   : > { %p1293_p1 = pneg %p1292_p2 }
  0x4f   : > { %p1299_p5 = por %p1298_p3, %p1297_p10 }
  0x51   : > { %p1300_p9 = pnand %p1299_p5, %p1293_p1 }
  0x53   : > { %1303 = shalt.err (!%p1300_p9)
}
  0x54   : > { %s1304_s30 = scalar_lea.vmem %s1572_s28, 128  ;;  %s1397_s11 = smov [#allocation3]  }
  0x55   : > { %p1305_p12 = scmp.ne.s32.totalorder %s1572_s28, %s1304_s30  ;;  %s1309_s23 = sshll.u32 %s1397_s11, 4  ;;  %s1310_s23 = int_to_ptr.vmem [resolvable:$false] %s1309_s23 }
  0x56   : > { %s1311_s7 = scalar_lea.vmem %s1310_s23, 256  ;;  %p1312_p4 = scmp.lt.s32.totalorder %s1572_s28, %s1310_s23 }
  0x57   : > { %p1307_p2 = pnand %p1305_p12, %p1291_p0  ;;  %p1313_p13 = scmp.lt.s32.totalorder %s1311_s7, %s1304_s30 }
  0x59   : > { %p1308_p7 = pneg %p1307_p2  ;;  %p1314_p6 = por %p1313_p13, %p1312_p4 }
  0x5b   : > { %p1315_p10 = pnand %p1314_p6, %p1308_p7 }
  0x5d   : > { %1318 = shalt.err (!%p1315_p10)
}
  0x5e   : > { %1125 = dma.hbm_to_vmem [thread:$0]  (!%p1574_p11), %s1570_s10, 128, %s1572_s28, %s1578_s15, %s1395_s12, %s1395_s12, %s1396_s13  }
  0x5f   : > { %231 = sbr.rel (%p1474_p8) target bundleno = 650 (0x28a), region = 40  ;;  %s1612_s17 = sand.u32 (!%p1474_p8), 1, %s1381_s19  }
  0x60   : > { %s945_s6 = sshll.u32 (!%p1474_p8), %s1612_s17, 3  ;;  %s234_s8 = scalar_lea.sflag (!%p1474_p8), [#allocation4], %s1612_s17 }
  0x61   : > { %s1618_s14 = scalar_lea.vmem (!%p1474_p8), [#allocation3], %s945_s6  ;;  %p1747_p4 = scmp.ne.s32.totalorder (!%p1474_p8), %s1740_s24, 0 }
  0x66   : > { %1364 = dma.done.wait (%p1747_p4), %s234_s8, 128  }
  0x67   : > { %1366 = vsyncadd (%p1747_p4), %s234_s8, 4294967168  ;;  %p1748_p7 = scmp.eq.s32.totalorder %s1455_s22, 0 }
  0x69   : > { %1368 = dma.done.wait (%p1748_p7), [#allocation7], 5120   ;;  %p1749_p8 = pmov %p1748_p7 }
  0x6a   : > { %v1398_v0 = vmov 0   ;;  %v1399_v1 = vmov 0.0   ;;  %v1179_v2 = vld [vmem:[#allocation6 + $0x4] ss:$8 sps:$4 sm:$0xff]   ;;  %v1181_v3 = vld [vmem:[#allocation6] ss:$8 sps:$4 sm:$0xff]   ;;  %v293_v35 = vlaneseq }
  0x6b   : > { %1370 = vsyncadd (%p1749_p8), [#allocation7], 4294962176  ;;  %421 = vmatprep.mubr.bf16.mxu0 %v1398_v0  ;;  %1043 = vmatprep.subr.bf16.mxu1 %v1399_v1  ;;  %v1182_v4 = vld [vmem:[#allocation6 + $0x14] ss:$8 sps:$4 sm:$0xff]   ;;  %v1184_v5 = vld [vmem:[#allocation6 + $0x10] ss:$8 sps:$4 sm:$0xff]  }
  0x6c   : > { %389 = vmatprep.subr.bf16.mxu0 %v1179_v2  ;;  %v1185_v6 = vld [vmem:[#allocation6 + $0x24] ss:$8 sps:$4 sm:$0xff]   ;;  %v1187_v7 = vld [vmem:[#allocation6 + $0x20] ss:$8 sps:$4 sm:$0xff]   ;;  %v1188_v8 = vld [vmem:[#allocation6 + $0x34] ss:$8 sps:$4 sm:$0xff]  }
  0x6d   : > { %390 = vmatpush1.bf16.msra.mxu0 %v1181_v3  ;;  %v1190_v9 = vld [vmem:[#allocation6 + $0x30] ss:$8 sps:$4 sm:$0xff]   ;;  %v1191_v10 = vld [vmem:[#allocation6 + $0x44] ss:$8 sps:$4 sm:$0xff]   ;;  %v1193_v13 = vld [vmem:[#allocation6 + $0x40] ss:$8 sps:$4 sm:$0xff]  }
  0x6e   : > { %391 = vmatprep.subr.bf16.mxu0 %v1182_v4  ;;  %v1204_v11 = vld [vmem:[#allocation8 + $0x40] sm:$0xff]   ;;  %v1206_v12 = vld [vmem:[#allocation8 + $0x48] sm:$0xff]   ;;  %v1194_v14 = vld [vmem:[#allocation6 + $0x54] ss:$8 sps:$4 sm:$0xff]   ;;  %vm1400_vm0 = vmmov 0   ;;  %v1650_v36 = vshrl.u32 %v293_v35, 7 }
  0x6f   : > { %1044 = vmatpush3.bf16.msra.mxu1 %v1204_v11  ;;  %v1196_v15 = vld [vmem:[#allocation6 + $0x50] ss:$8 sps:$4 sm:$0xff]   ;;  %v1197_v16 = vld [vmem:[#allocation6 + $0x64] ss:$8 sps:$4 sm:$0xff]   ;;  %v1199_v17 = vld [vmem:[#allocation6 + $0x60] ss:$8 sps:$4 sm:$0xff]   ;;  %1059 = vmatprep.mubr.msk.bf16.mxu1 %vm1400_vm0, %v1399_v1 }
  0x70   : > { %1045 = vmatprep.subr.bf16.mxu1 %v1399_v1  ;;  %v1200_v18 = vld [vmem:[#allocation6 + $0x74] ss:$8 sps:$4 sm:$0xff]   ;;  %v1202_v19 = vld [vmem:[#allocation6 + $0x70] ss:$8 sps:$4 sm:$0xff]   ;;  %v1205_v21 = vld [vmem:[#allocation8] sm:$0xff]   ;;  %v295_v37 = vsub.s32 0, %v1650_v36 }
  0x71   : > { %392 = vmatpush1.bf16.msra.mxu0 %v1184_v5  ;;  %v1203_v20 = vld [vmem:[%s1618_s14] sm:$0xff]   ;;  %v1207_v22 = vld [vmem:[#allocation8 + $0x8] sm:$0xff]   ;;  %v1212_v27 = vld [vmem:[#allocation8 + $0x60] sm:$0xff]   ;;  %vm498_vm1 = vcmask 1044480   ;;  %vm598_vm2 = vcmask 1045504   ;;  %s1010_s10 = sshll.u32 %s1455_s22, 7 }
  0x72   : > { %393 = vmatprep.subr.bf16.mxu0 %v1185_v6  ;;  %v1208_v23 = vld [vmem:[#allocation8 + $0x50] sm:$0xff]   ;;  %v1210_v25 = vld [vmem:[#allocation8 + $0x58] sm:$0xff]   ;;  %v1213_v28 = vld [vmem:[#allocation8 + $0x20] sm:$0xff]   ;;  %s271_s28 = scalar_lea.vmem [#allocation9], %s945_s6  ;;  %s1685_s11 = scalar_lea.hbm %s1736_s5, %s1010_s10 }
  0x73   : > { %1046 = vmatpush3.bf16.msra.mxu1 %v1206_v12  ;;  %v1209_v24 = vld [vmem:[#allocation8 + $0x10] sm:$0xff]   ;;  %v1211_v26 = vld [vmem:[#allocation8 + $0x18] sm:$0xff]   ;;  %v1214_v29 = vld [vmem:[#allocation8 + $0x68] sm:$0xff]   ;;  %s844_s15 = sshll.u32 %s271_s28, 4  ;;  %s831_s23 = scalar_lea.sflag [#allocation5], %s1612_s17  ;;  %s1687_s15 = int_to_ptr.vmem [resolvable:$true] %s844_s15 }
  0x74   : > { %1047 = vmatprep.subr.bf16.mxu1 %v1399_v1  ;;  %v1215_v30 = vld [vmem:[#allocation8 + $0x28] sm:$0xff]   ;;  %v1216_v31 = vld [vmem:[#allocation8 + $0x70] sm:$0xff]   ;;  %v1218_v33 = vld [vmem:[#allocation8 + $0x78] sm:$0xff]   ;;  %s1319_s7 = scalar_lea.vmem %s1687_s15, 128  ;;  %p1750_p0 = scmp.ne.s32.totalorder %s1745_s29, 0 }
  0x75   : > { %394 = vmatpush1.bf16.msra.mxu0 %v1187_v7  ;;  %v1217_v32 = vld [vmem:[#allocation8 + $0x30] sm:$0xff]   ;;  %v1219_v34 = vld [vmem:[#allocation8 + $0x38] sm:$0xff]   ;;  %v1656_v38 = vld [vmem:[%s1733_s2] sm:$0x3]  ;;  %p1320_p11 = scmp.ne.s32.totalorder %s1687_s15, %s1319_s7  ;;  %s1401_s22 = smov [#allocation9]  }
  0x76   : > { %395 = vmatprep.subr.bf16.mxu0 %v1188_v8  ;;  %v296_v39 = vrot.slane %v1656_v38, %v295_v37  ;;  %v1224_v0 = vld [vmem:[#allocation8 + $0x80] sm:$0xff]   ;;  %v1225_v4 = vld [vmem:[#allocation8 + $0x88] sm:$0xff]   ;;  %v1226_v5 = vld [vmem:[#allocation8 + $0x90] sm:$0xff]   ;;  %s1323_s6 = sshll.u32 %s1401_s22, 4  ;;  %s1324_s6 = int_to_ptr.vmem [resolvable:$false] %s1323_s6 }
  0x77   : > { %1048 = vmatpush3.bf16.msra.mxu1 %v1208_v23  ;;  %v1227_v6 = vld [vmem:[#allocation8 + $0x98] sm:$0xff]   ;;  %v1228_v7 = vld [vmem:[#allocation8 + $0xa0] sm:$0xff]   ;;  %v1229_v8 = vld [vmem:[#allocation8 + $0xa8] sm:$0xff]   ;;  %v299_v23 = vsub.s32 1, %v1650_v36  ;;  %p1321_p1 = pnand %p1320_p11, %p1750_p0  ;;  %s1325_s8 = scalar_lea.vmem %s1324_s6, 256 }
  0x78   : > { %1049 = vmatprep.subr.bf16.mxu1 %v1399_v1  ;;  %p1326_p5 = scmp.lt.s32.totalorder %s1687_s15, %s1324_s6  ;;  %p1327_p9 = scmp.lt.s32.totalorder %s1325_s8, %s1319_s7 }
  0x79   : > { %396 = vmatpush1.bf16.msra.mxu0 %v1190_v9  ;;  %v1230_v9 = vld [vmem:[#allocation8 + $0xb0] sm:$0xff]   ;;  %p1322_p3 = pneg %p1321_p1 }
  0x7a   : > { %397 = vmatprep.subr.bf16.mxu0 %v1191_v10  ;;  %v1231_v10 = vld [vmem:[#allocation8 + $0xb8] sm:$0xff]   ;;  %p1328_p12 = por %p1327_p9, %p1326_p5 }
  0x7b   : > { %1050 = vmatpush3.bf16.msra.mxu1 %v1210_v25  ;;  %v300_v25 = vrot.slane %v1656_v38, %v299_v23 }
  0x7c   : > { %1051 = vmatprep.subr.bf16.mxu1 %v1399_v1  ;;  %p1329_p2 = pnand %p1328_p12, %p1322_p3 }
  0x7d   : > { %398 = vmatpush1.bf16.msra.mxu0 %v1193_v13 }
  0x7e   : > { %399 = vmatprep.subr.bf16.mxu0 %v1194_v14 }
  0x7f   : > { %1052 = vmatpush3.bf16.msra.mxu1 %v1212_v27 }
  0x80   : > { %1053 = vmatprep.subr.bf16.mxu1 %v1399_v1 }
  0x81   : > { %400 = vmatpush1.bf16.msra.mxu0 %v1196_v15 }
  0x82   : > { %401 = vmatprep.subr.bf16.mxu0 %v1197_v16 }
  0x83   : > { %1054 = vmatpush3.bf16.msra.mxu1 %v1214_v29 }
  0x84   : > { %1055 = vmatprep.subr.bf16.mxu1 %v1399_v1 }
  0x85   : > { %402 = vmatpush1.bf16.msra.mxu0 %v1199_v17 }
  0x86   : > { %403 = vmatprep.subr.bf16.mxu0 %v1200_v18 }
  0x87   : > { %1056 = vmatpush3.bf16.msra.mxu1 %v1216_v31 }
  0x88   : > { %1057 = vmatprep.subr.bf16.mxu1 %v1399_v1 }
  0x89   : > { %404 = vmatpush1.bf16.msra.mxu0 %v1202_v19 }
  0x8a   : > { %1063 = vmatprep.subr.bf16.mxu0 %v1399_v1 }
  0x8b   : > { %1058 = vmatpush3.bf16.msra.mxu1 %v1218_v33 }
  0x8c   : > { %422 = vmatmul.mubr.bf16.vlgmr.msra.gmra.mrb[0].mxu0 %v1203_v20  ;;  %1083 = vmatprep.subr.bf16.mxu1 %v1399_v1 }
  0x8d   : > { %1064 = vmatpush3.bf16.msra.mxu0 %v1205_v21  ;;  %1079 = vmatprep.mubr.msk.bf16.mxu0 %vm1400_vm0, %v1399_v1 }
  0x8e   : > { %1065 = vmatprep.subr.bf16.mxu0 %v1399_v1 }
  0x91   : > { %1066 = vmatpush3.bf16.msra.mxu0 %v1207_v22 }
  0x92   : > { %1067 = vmatprep.subr.bf16.mxu0 %v1399_v1 }
  0x95   : > { %1068 = vmatpush3.bf16.msra.mxu0 %v1209_v24 }
  0x96   : > { %1069 = vmatprep.subr.bf16.mxu0 %v1399_v1 }
  0x99   : > { %1070 = vmatpush3.bf16.msra.mxu0 %v1211_v26 }
  0x9a   : > { %1071 = vmatprep.subr.bf16.mxu0 %v1399_v1 }
  0x9d   : > { %1072 = vmatpush3.bf16.msra.mxu0 %v1213_v28 }
  0x9e   : > { %1073 = vmatprep.subr.bf16.mxu0 %v1399_v1 }
  0xa1   : > { %1074 = vmatpush3.bf16.msra.mxu0 %v1215_v30 }
  0xa2   : > { %1075 = vmatprep.subr.bf16.mxu0 %v1399_v1 }
  0xa5   : > { %1076 = vmatpush3.bf16.msra.mxu0 %v1217_v32 }
  0xa6   : > { %1077 = vmatprep.subr.bf16.mxu0 %v1399_v1 }
  0xa9   : > { %1078 = vmatpush3.bf16.msra.mxu0 %v1219_v34 }
 0x15f   : > { %v423_v40 = vpop.f32.mrb[0].mxu0 }
 0x160   : > { %v424_v41 = vadd.f32 %v423_v40, %v296_v39  ;;  %v1659_v42 = vpop.f32.mrb[1].mxu0 }
 0x161   : > { %v427_v43 = vpop.f32.mrb[2].mxu0  ;;  %v426_v32 = vadd.f32 %v1659_v42, %v300_v25 }
 0x162   : > { %v432_v44 = vmax.f32 %v424_v41, 0.0  ;;  %v428_v45 = vadd.f32 %v427_v43, %v296_v39  ;;  %v1661_v46 = vpop.f32.mrb[3].mxu0 }
 0x163   : > { %v430_v35 = vadd.f32 %v1661_v46, %v300_v25 }
 0x164   : > { %v1006_v47 = vpack.c.bf16 %v432_v44, %v432_v44  ;;  %v433_v48 = vmax.f32 %v428_v45, 0.0 }
 0x166   : > { %442 = vst [vmem:[#allocation2 + $0x4] sm:$0xf] %v1006_v47  ;;  %v434_v49 = vpack.c.bf16 %v433_v48, %v432_v44  ;;  %v1007_v50 = vpack.c.bf16 %v433_v48, %v433_v48 }
 0x168   : > { %443 = vst [vmem:[#allocation2 + $0x8] sm:$0xf] %v1007_v50  ;;  %v445_v51 = vpack.i.b16 %v434_v49, %v434_v49 }
 0x16a   : > { %v450_v52 = vrot.slane %v445_v51, %v295_v37 }
 0x16c   : > { %451 = vst [vmem:[#allocation2] sm:$0xf] %v450_v52 }
 0x16d   : > { %v453_v55 = vld [vmem:[#allocation2 + $0x4] sm:$0xf] }
 0x16f   : > { %v1221_v53 = vld [vmem:[#allocation2 + $0x8] ss:$0 sps:$4 sm:$0x77]  }
 0x170   : > { %v1223_v54 = vld [vmem:[#allocation2 + $0x8] ss:$0 sps:$4 sm:$0x33]   ;;  %v500_v61 = vrot.slane %v1221_v53, 3 }
 0x171   : > { %v600_v63 = vrot.slane %v1223_v54, 2  ;;  %v692_v11 = vld [vmem:[#allocation2 + $0x8] sm:$0xf] }
 0x172   : > { %v988_v12 = vcombine.low %v453_v55, %v692_v11 }
 0x173   : > { %v471_v56 = vld [vmem:[#allocation2] sm:$0x8] }
 0x174   : > { %v452_v57 = vld [vmem:[#allocation2] sm:$0xc]  ;;  %v968_v58 = vcombine.low %v471_v56, %v453_v55 }
 0x175   : > { %v978_v59 = vcombine.low %v452_v57, %v453_v55 }
 0x176   : > { %v499_v60 = vrot.slane %v968_v58, 3 }
 0x177   : > { %v599_v62 = vrot.slane %v978_v59, 2 }
 0x178   : > { %v501_v2 = vsel %vm498_vm1, %v499_v60, %v500_v61 }
 0x179   : > { %v601_v3 = vsel %vm598_vm2, %v599_v62, %v600_v63  ;;  %1060 = vmatmul.mubr.bf16.vlgmr.msra.gmra.mrb[0].mxu1 %v501_v2 }
 0x17a   : > { %1080 = vmatmul.mubr.bf16.vlgmr.msra.gmra.mrb[4].mxu0 %v601_v3  ;;  %1084 = vmatpush3.bf16.msra.mxu1 %v1224_v0 }
 0x17b   : > { %1099 = vmatprep.mubr.msk.bf16.mxu1 %vm1400_vm0, %v1399_v1  ;;  %1085 = vmatprep.subr.bf16.mxu1 %v1399_v1 }
 0x17e   : > { %1086 = vmatpush3.bf16.msra.mxu1 %v1225_v4 }
 0x17f   : > { %1087 = vmatprep.subr.bf16.mxu1 %v1399_v1 }
 0x182   : > { %1088 = vmatpush3.bf16.msra.mxu1 %v1226_v5 }
 0x183   : > { %1089 = vmatprep.subr.bf16.mxu1 %v1399_v1 }
 0x186   : > { %1090 = vmatpush3.bf16.msra.mxu1 %v1227_v6 }
 0x187   : > { %1091 = vmatprep.subr.bf16.mxu1 %v1399_v1 }
 0x18a   : > { %1092 = vmatpush3.bf16.msra.mxu1 %v1228_v7 }
 0x18b   : > { %1093 = vmatprep.subr.bf16.mxu1 %v1399_v1 }
 0x18e   : > { %1094 = vmatpush3.bf16.msra.mxu1 %v1229_v8 }
 0x18f   : > { %1095 = vmatprep.subr.bf16.mxu1 %v1399_v1 }
 0x192   : > { %1096 = vmatpush3.bf16.msra.mxu1 %v1230_v9 }
 0x193   : > { %1097 = vmatprep.subr.bf16.mxu1 %v1399_v1  ;;  %v997_v1 = vld [vmem:[%s1735_s4] ss:$0 sm:$0xff] }
 0x196   : > { %1098 = vmatpush3.bf16.msra.mxu1 %v1231_v10 }
 0x199   : > { %1100 = vmatmul.mubr.bf16.vlgmr.msra.gmra.mrb[4].mxu1 %v988_v12 }
 0x24c   : > { %v585_v13 = vpop.f32.mrb[0].mxu1 }
 0x24d   : > { %v685_v14 = vpop.f32.mrb[4].mxu0  ;;  %v1061_v16 = vpop.f32.mrb[1].mxu1 }
 0x24e   : > { %v686_v15 = vadd.f32 %v685_v14, %v585_v13  ;;  %v1081_v17 = vpop.f32.mrb[5].mxu0  ;;  %v588_v18 = vpop.f32.mrb[2].mxu1 }
 0x24f   : > { %v688_v19 = vpop.f32.mrb[6].mxu0  ;;  %v1062_v21 = vpop.f32.mrb[3].mxu1 }
 0x250   : > { %v689_v20 = vadd.f32 %v688_v19, %v588_v18  ;;  %v1082_v22 = vpop.f32.mrb[7].mxu0 }
 0x26c   : > { %v796_v24 = vpop.f32.mrb[4].mxu1 }
 0x26d   : > { %v803_v26 = vadd.f32 %v796_v24, %v686_v15  ;;  %v1101_v27 = vpop.f32.mrb[5].mxu1 }
 0x26e   : > { %v799_v28 = vpop.f32.mrb[6].mxu1 }
 0x26f   : > { %v812_v29 = vadd.f32 %v997_v1, %v803_v26  ;;  %v804_v30 = vadd.f32 %v799_v28, %v689_v20  ;;  %v1102_v31 = vpop.f32.mrb[7].mxu1 }
 0x271   : > { %v814_v33 = vmax.f32 %v812_v29, 0.0  ;;  %v813_v34 = vadd.f32 %v997_v1, %v804_v30 }
 0x273   : > { %v816_v36 = vadd.f32 %v814_v33, %v426_v32  ;;  %v815_v37 = vmax.f32 %v813_v34, 0.0 }
 0x275   : > { %v817_v39 = vadd.f32 %v815_v37, %v430_v35  ;;  %v818_v38 = vmax.f32 %v816_v36, 0.0 }
 0x277   : > { %v819_v40 = vmax.f32 %v817_v39, 0.0 }
 0x279   : > { %v1014_v41 = vpack.c.bf16 %v819_v40, %v818_v38 }
 0x27b   : > { %1015 = vst [vmem:[%s271_s28] sm:$0xff] %v1014_v41  }
 0x27c   : > { %1332 = shalt.err (!%p1329_p2)
}
 0x27d   : > { %s1333_s14 = scalar_lea.hbm %s1685_s11, 128  ;;  %s1337_s12 = scalar_lea.hbm %s1736_s5, 256 }
 0x27e   : > { %p1334_p13 = scmp.ne.s32.totalorder %s1685_s11, %s1333_s14  ;;  %p1338_p4 = scmp.lt.u32.totalorder %s1685_s11, %s1736_s5 }
 0x27f   : > { %p1339_p7 = scmp.lt.u32.totalorder %s1337_s12, %s1333_s14  ;;  %p1341_p11 = scmp.lt.u32.totalorder %s1333_s14, %s1685_s11 }
 0x280   : > { %p1335_p6 = pnand %p1334_p13, %p1750_p0 }
 0x281   : > { %p1340_p8 = por %p1339_p7, %p1338_p4 }
 0x282   : > { %p1336_p10 = pneg %p1335_p6 }
 0x283   : > { %p1342_p1 = por %p1341_p11, %p1340_p8 }
 0x285   : > { %p1343_p3 = pnand %p1342_p1, %p1336_p10 }
 0x287   : > { %1346 = shalt.err (!%p1343_p3)
}
 0x288   : > { %s1402_s28 = smov 64   ;;  %s1403_s9 = smov 4  }
 0x289   : > { %1113 = dma.vmem_to_hbm [thread:$0]  (%p1750_p0), %s1687_s15, 128, %s1685_s11, %s831_s23, %s1402_s28, %s1402_s28, %s1403_s9  }
 0x28a PF: > { %s859_s30 = sand.u32 1, %s1377_s18   ;;  %p1751_p5 = scmp.ne.s32.totalorder %s1741_s25, 0 }
 0x28b   : > { %p1752_p9 = scmp.ge.s32.totalorder %s1389_s21, 2  ;;  %s860_s7 = scalar_lea.sflag [#allocation5], %s859_s30 }
 0x28d   : > { %p1127_p12 = pnand %p1752_p9, %p1751_p5 }
 0x28f   : > { %1372 = dma.done.wait (!%p1127_p12), %s860_s7, 128  }
 0x290   : > { %1374 = vsyncadd (!%p1127_p12), %s860_s7, 4294967168  ;;  %p19_p2 = scmp.ge.s32.totalorder %s1547_s16, 4   ;;  %s1753_s18 = smov %s1381_s19 }
 0x291   : > { %s1754_s19 = smov %s1385_s20  ;;  %s1755_s20 = smov %s1556_s27 }
 0x292   : > { %s1756_s21 = smov %s1547_s16  ;;  %21 = sbr.rel (!%p19_p2) target bundleno = 6 (0x6), region = 95 }
 0x299   :  { %865 = vsyncpa [#allocation4], 1 }
 0x29a   :  { %867 = vsyncpa [#allocation4 + $0x1], 1 }
 0x29b   :  { %868 = vsyncpa [#allocation7], 1 }
 0x29c   :  { %869 = vsyncpa [#allocation5], 1 }
 0x29d   :  { %871 = vsyncpa [#allocation5 + $0x1], 1 }

</bundles_post_ra>
